<compile_context>
chip_gen: v7x
topology: tpu7x:2x2x1
jax: 0.10.0
libtpu: 0.0.40
codegen_flags: <defaults>
</compile_context>

<pallas_src>
import functools

import jax
import jax.numpy as jnp
from jax.experimental import pallas as pl
from jax.experimental.pallas import tpu as pltpu


def _round_up(x, m):
    return ((x + m - 1) // m) * m


def _pick_div_tile(extent, cap, unit):
    """Largest multiple of `unit` that divides `extent` and is <= cap.

    `extent` must be a multiple of `unit`, so `unit` itself always works.
    """
    t = min(cap, extent)
    t -= t % unit
    while t > unit and extent % t != 0:
        t -= unit
    return max(t, unit)


# ----------------------------- kernels ---------------------------------------

def _mm_bias_relu_kernel(x_ref, w_ref, b_ref, o_ref):
    # Single-K-block fast path: no accumulator scratch, no K grid axis.
    # x_ref: (tm, K) bf16, w_ref: (K, tn) bf16 (BN scale pre-folded),
    # b_ref: (1, tn) f32 folded bias, o_ref: (tm, tn) f32.
    y = jnp.dot(x_ref[...], w_ref[...], preferred_element_type=jnp.float32)
    o_ref[...] = jnp.maximum(y + b_ref[...], 0.0).astype(o_ref.dtype)


def _mm_bias_relu_acc_kernel(x_ref, w_ref, b_ref, o_ref, acc_ref):
    # General path: K-reduction grid axis with an f32 VMEM accumulator.
    k = pl.program_id(2)

    @pl.when(k == 0)
    def _():
        acc_ref[...] = jnp.zeros_like(acc_ref)

    acc_ref[...] += jnp.dot(x_ref[...], w_ref[...],
                            preferred_element_type=jnp.float32)

    @pl.when(k == pl.num_programs(2) - 1)
    def _():
        o_ref[...] = jnp.maximum(acc_ref[...] + b_ref[...], 0.0).astype(o_ref.dtype)


# --------------------------- host-side glue -----------------------------------

def _im2col(x, kh, kw, stride, padding):
    # x: (N, C, H, W); returns (N*Ho*Wo, C*kh*kw) in x.dtype, plus (Ho, Wo).
    n, c, h, w = x.shape
    xp = jnp.pad(x, ((0, 0), (0, 0), (padding, padding), (padding, padding)))
    ho = (h + 2 * padding - kh) // stride + 1
    wo = (w + 2 * padding - kw) // stride + 1
    taps = []
    for i in range(kh):
        for j in range(kw):
            taps.append(xp[:, :, i:i + stride * ho:stride, j:j + stride * wo:stride])
    # (N, C, kh*kw, Ho, Wo) -> (N, Ho, Wo, C, kh*kw) -> (N*Ho*Wo, C*kh*kw)
    col = jnp.stack(taps, axis=2)
    col = col.transpose(0, 3, 4, 1, 2).reshape(n * ho * wo, c * kh * kw)
    return col, ho, wo


@functools.partial(jax.jit, static_argnames=("kernel_size", "stride", "padding"))
def conv_block_forward(x, weight, bias, gamma, beta, running_mean, running_var,
                       *, kernel_size, stride, padding, eps=1e-5):
    """ConvBlock forward: Conv2d -> BatchNorm2d (eval, running stats) -> ReLU.

    x: (N, C_in, H, W) NCHW float32
    weight: (C_out, C_in, kh, kw), bias: (C_out,)
    returns: (N, C_out, H_out, W_out) NCHW float32
    """
    n, c_in, _, _ = x.shape
    c_out = weight.shape[0]
    kh = kw = kernel_size

    # --- glue: bf16 im2col + BN folding (plain JAX) ---
    # Activations are cast to bf16 BEFORE im2col so the kh*kw-duplicated X_col
    # is materialized in HBM at half width (MXU operands are bf16 anyway).
    # TODO(synk): an NHWC in-kernel shifted-matmul (per-tap BlockSpecs) would
    # remove the im2col HBM duplication entirely.
    x_col, ho, wo = _im2col(x.astype(jnp.bfloat16), kh, kw, stride, padding)
    m, k = x_col.shape

    # Fold eval-mode BN into weights/bias in f32:
    #   y = conv(x, W)*s + (b - mean)*s + beta,   s = gamma * rsqrt(var + eps)
    inv_std = jax.lax.rsqrt(running_var.astype(jnp.float32) + eps)
    bn_scale = gamma.astype(jnp.float32) * inv_std                       # (C_out,)
    bn_bias = (beta + (bias - running_mean) * bn_scale).astype(jnp.float32)
    w_col = weight.reshape(c_out, c_in * kh * kw).T.astype(jnp.float32)
    w_col = w_col * bn_scale[None, :]                                    # fold scale in f32

    # ---- tile / padding selection (generation-safe VMEM budget) ----
    TM_CAP, TK_CAP, TN_CAP = 1024, 1024, 512
    K_SINGLE_MAX = 2048          # K fits one block -> drop K grid axis + scratch

    # K (contraction): unpadded single block when small; else pad to 128 multiple.
    if k <= K_SINGLE_MAX:
        k_pad, tk, multi_k = k, k, False
    else:
        k_pad = _round_up(k, 128)
        tk = _pick_div_tile(k_pad, TK_CAP, 128)
        multi_k = True

    # C_out (lanes): lane-dense pad only when the inflation is modest.
    c_out_pad128 = _round_up(c_out, 128)
    if c_out_pad128 >= 4 * c_out:
        # Tiny channel count: padding would inflate output bytes / MXU work >=4x.
        c_out_pad, tn = c_out, c_out
    else:
        c_out_pad = c_out_pad128
        tn = _pick_div_tile(c_out_pad, TN_CAP, 128)

    # M (output pixels): big tiles to amortize the ~0.35 us per-grid-step cost.
    m_pad = _round_up(m, 16)
    if m_pad > TM_CAP:
        tm = TM_CAP
        m_pad = _round_up(m, TM_CAP)
    else:
        tm = m_pad
    # v7x has 2 TensorCores/chip: guarantee >=2 blocks along the parallel axes
    # so both cores get work (negligible cost on v5e/v6e).
    while (m_pad // tm) * (c_out_pad // tn) < 2 and tm >= 64 and tm % 32 == 0:
        tm //= 2

    # Zero padding (zeros contribute nothing to the dot / ReLU output).
    if (m_pad, k_pad) != (m, k):
        x_col = jnp.pad(x_col, ((0, m_pad - m), (0, k_pad - k)))
    w_col_p = jnp.pad(w_col, ((0, k_pad - k), (0, c_out_pad - c_out))).astype(jnp.bfloat16)
    b_row = jnp.pad(bn_bias, (0, c_out_pad - c_out)).reshape(1, c_out_pad)

    if multi_k:
        grid = (m_pad // tm, c_out_pad // tn, k_pad // tk)
        in_specs = [
            pl.BlockSpec((tm, tk), lambda i, j, kk: (i, kk)),
            pl.BlockSpec((tk, tn), lambda i, j, kk: (kk, j)),
            pl.BlockSpec((1, tn), lambda i, j, kk: (0, j)),
        ]
        out_spec = pl.BlockSpec((tm, tn), lambda i, j, kk: (i, j))
        scratch_shapes = [pltpu.VMEM((tm, tn), jnp.float32)]
        dim_sem = ("parallel", "parallel", "arbitrary")
        kernel = _mm_bias_relu_acc_kernel
    else:
        grid = (m_pad // tm, c_out_pad // tn)
        in_specs = [
            pl.BlockSpec((tm, tk), lambda i, j: (i, 0)),
            pl.BlockSpec((tk, tn), lambda i, j: (0, j)),
            pl.BlockSpec((1, tn), lambda i, j: (0, j)),
        ]
        out_spec = pl.BlockSpec((tm, tn), lambda i, j: (i, j))
        scratch_shapes = []
        dim_sem = ("parallel", "parallel")
        kernel = _mm_bias_relu_kernel

    cost = pl.CostEstimate(
        flops=int(2 * m_pad * k_pad * c_out_pad),
        transcendentals=0,
        bytes_accessed=int(m_pad * k_pad * 2 + k_pad * c_out_pad * 2
                           + c_out_pad * 4 + m_pad * c_out_pad * 4),
    )

    # --- hot path: fused matmul + folded-BN bias + ReLU in Pallas ---
    out_flat = pl.pallas_call(
        kernel,
        out_shape=jax.ShapeDtypeStruct((m_pad, c_out_pad), jnp.float32),
        grid_spec=pltpu.PrefetchScalarGridSpec(
            num_scalar_prefetch=0,
            grid=grid,
            in_specs=in_specs,
            out_specs=out_spec,
            scratch_shapes=scratch_shapes,
        ),
        compiler_params=pltpu.CompilerParams(
            dimension_semantics=dim_sem,
            # Per-step working set is <= ~16 MiB with the caps above; 32 MiB is
            # safe on every generation (v7x 64 MiB physical, v5e/v6e 128 MiB).
            vmem_limit_bytes=32 * 1024 * 1024,
        ),
        cost_estimate=cost,
    )(x_col, w_col_p, b_row)

    out_flat = out_flat[:m, :c_out]                              # (N*Ho*Wo, C_out)
    # TODO(synk): output kept NCHW + f32 to match the PyTorch module; an
    # NHWC/bf16 end-to-end network would drop this transpose + widening pass.
    return out_flat.reshape(n, ho, wo, c_out).transpose(0, 3, 1, 2)


def _reference(x, weight, bias, gamma, beta, running_mean, running_var,
               *, stride, padding, eps=1e-5):
    # Pure-JAX f32 reference (lax conv) for correctness check.
    y = jax.lax.conv_general_dilated(
        x, weight, window_strides=(stride, stride),
        padding=[(padding, padding), (padding, padding)],
        dimension_numbers=("NCHW", "OIHW", "NCHW"))
    y = y + bias.reshape(1, -1, 1, 1)
    inv_std = jax.lax.rsqrt(running_var + eps)
    y = (y - running_mean.reshape(1, -1, 1, 1)) * (gamma * inv_std).reshape(1, -1, 1, 1) \
        + beta.reshape(1, -1, 1, 1)
    return jnp.maximum(y, 0.0)


if __name__ == "__main__":
    # Small shapes consistent with the module: batch=2, in_ch=4, out_ch=8,
    # spatial=16, kernel=3, stride=1, padding=1.
    N, C_IN, C_OUT, H, W = 2, 4, 8, 16, 16
    K, S, P = 3, 1, 1

    key = jax.random.PRNGKey(0)
    kx, kw_, kb, kg, kbe, km, kv = jax.random.split(key, 7)

    x = jax.random.normal(kx, (N, C_IN, H, W), dtype=jnp.float32)
    weight = jax.random.normal(kw_, (C_OUT, C_IN, K, K), dtype=jnp.float32) * 0.1
    bias = jax.random.normal(kb, (C_OUT,), dtype=jnp.float32) * 0.1
    gamma = 1.0 + 0.1 * jax.random.normal(kg, (C_OUT,), dtype=jnp.float32)
    beta = 0.1 * jax.random.normal(kbe, (C_OUT,), dtype=jnp.float32)
    running_mean = 0.1 * jax.random.normal(km, (C_OUT,), dtype=jnp.float32)
    running_var = jnp.abs(1.0 + 0.1 * jax.random.normal(kv, (C_OUT,), dtype=jnp.float32))

    # TODO(synk): BatchNorm is applied in eval mode (running stats); training-mode
    # batch statistics are not computed in-kernel.
    out = conv_block_forward(x, weight, bias, gamma, beta, running_mean,
                             running_var, kernel_size=K, stride=S, padding=P)
    out = jax.block_until_ready(out)

    ref = _reference(x, weight, bias, gamma, beta, running_mean, running_var,
                     stride=S, padding=P)
    assert out.shape == (N, C_OUT, H, W), out.shape
    # bf16 MXU operands (activations + scale-folded weights) -> relaxed tolerance.
    assert jnp.allclose(out, ref, atol=5e-2, rtol=5e-2), \
        float(jnp.max(jnp.abs(out - ref)))

    print("KERNEL_OK")
</pallas_src>

<mosaic_0001>
module attributes {stable_mosaic.version = 11 : i64} {
  func.func @_mm_bias_relu_kernel(%arg0: i32, %arg1: i32, %arg2: memref<256x36xbf16, #tpu.memory_space<vmem>>, %arg3: memref<36x8xbf16, #tpu.memory_space<vmem>>, %arg4: memref<1x8xf32, #tpu.memory_space<vmem>>, %arg5: memref<256x8xf32, #tpu.memory_space<vmem>>) attributes {dimension_semantics = [#tpu.dimension_semantics<parallel>, #tpu.dimension_semantics<parallel>], iteration_bounds = array<i64: 2, 1>, scalar_prefetch = 0 : i64, scratch_operands = 0 : i64, tpu.core_type = #tpu.core_type<tc>, window_params = [{transform_indices = @transform_0, window_bounds = array<i64: 256, 36>}, {transform_indices = @transform_1, window_bounds = array<i64: 36, 8>}, {transform_indices = @transform_2, window_bounds = array<i64: 1, 8>}, {transform_indices = @transform_3, window_bounds = array<i64: 256, 8>}]} {
    %c0 = arith.constant 0 : index
    %c0_0 = arith.constant 0 : index
    %0 = vector.load %arg2[%c0, %c0_0] : memref<256x36xbf16, #tpu.memory_space<vmem>>, vector<256x36xbf16>
    %c0_1 = arith.constant 0 : index
    %c0_2 = arith.constant 0 : index
    %1 = vector.load %arg3[%c0_1, %c0_2] : memref<36x8xbf16, #tpu.memory_space<vmem>>, vector<36x8xbf16>
    %cst = arith.constant dense<0.000000e+00> : vector<256x8xf32>
    %2 = tpu.matmul %0, %1, %cst {dimension_numbers = #tpu.dot_dimension_numbers<[1], [0], [0], [1], [0, 0, 1, 1], [], []>} : vector<256x36xbf16>, vector<36x8xbf16>, vector<256x8xf32> -> vector<256x8xf32>
    %c0_3 = arith.constant 0 : index
    %c0_4 = arith.constant 0 : index
    %3 = vector.load %arg4[%c0_3, %c0_4] : memref<1x8xf32, #tpu.memory_space<vmem>>, vector<1x8xf32>
    %4 = vector.broadcast %3 : vector<1x8xf32> to vector<256x8xf32>
    %5 = arith.addf %2, %4 : vector<256x8xf32>
    %cst_5 = arith.constant 0.000000e+00 : f32
    %6 = vector.broadcast %cst_5 : f32 to vector<256x8xf32>
    %7 = arith.maximumf %5, %6 : vector<256x8xf32>
    %c0_6 = arith.constant 0 : index
    %c0_7 = arith.constant 0 : index
    %8 = vector.load %arg5[%c0_6, %c0_7] : memref<256x8xf32, #tpu.memory_space<vmem>>, vector<256x8xf32>
    tpu.vector_store %arg5[%c0_6, %c0_7], %7 {strides = array<i32>} : memref<256x8xf32, #tpu.memory_space<vmem>>, vector<256x8xf32>,
    return
  }
  func.func @transform_0(%arg0: i32, %arg1: i32) -> (i32, i32) {
    %c0_i32 = arith.constant 0 : i32
    %c0_i32_0 = arith.constant 0 : i32
    return %arg0, %c0_i32 : i32, i32
  }
  func.func @transform_1(%arg0: i32, %arg1: i32) -> (i32, i32) {
    %c0_i32 = arith.constant 0 : i32
    %c0_i32_0 = arith.constant 0 : i32
    return %c0_i32, %arg1 : i32, i32
  }
  func.func @transform_2(%arg0: i32, %arg1: i32) -> (i32, i32) {
    %c0_i32 = arith.constant 0 : i32
    %c0_i32_0 = arith.constant 0 : i32
    return %c0_i32, %arg1 : i32, i32
  }
  func.func @transform_3(%arg0: i32, %arg1: i32) -> (i32, i32) {
    %c0_i32 = arith.constant 0 : i32
    return %arg0, %arg1 : i32, i32
  }
}

</mosaic_0001>

<bundles_post_ra>
// kernel: conv_block_forward.1
= control target key start
LH: loop header
LB: loop body
LE: loop exit
PB: predicated region body
PF: predicated region fallthrough
CT: control target
= control target key end

     0   :  { %s947_s12 = smov 0   ;;  %s949_s13 = smov 0   ;;  %s1130_s0 = inlined_call_operand.vmem [shape: bf16[512,36], index: 0, kind: input, shape index: {}]   ;;  %s1131_s1 = inlined_call_operand.vmem [shape: bf16[36,8], index: 1, kind: input, shape index: {}]   ;;  %s1132_s2 = inlined_call_operand.vmem [shape: f32[1,8], index: 2, kind: input, shape index: {}]   ;;  %s1133_s3 = inlined_call_operand.vmem [shape: f32[512,8], index: 3, kind: output, shape index: {}]  }
   0x1   :  { %s951_s14 = smov 0  }
   0x2 LB: > { %s25_s15 = sadd.s32 1, %s921_s13  ;;  %p752_p0 = scmp.ge.s32.totalorder %s925_s14, 1  ;;  %s925_s14 = sphi %s951_s14, %s13_s14   ;;  %s921_s13 = sphi %s949_s13, %s1135_s13   ;;  %s917_s12 = sphi %s947_s12, %s1134_s12  }
   0x3   : > { %p27_p1 = scmp.ge.s32.totalorder %s25_s15, 2  ;;  %p169_p2 = scmp.lt.s32.totalorder %s925_s14, 3 }
   0x5   : > { %s1137_s15 = smov (%p27_p1, %s25_s15), 0  ;;  %p170_p3 = pnand %p752_p0, %p169_p2 }
   0x6   : > { %v884_v0 = vld [vmem:[%s1131_s1] sm:$0xff] (!%p170_p3)   ;;  %v885_v1 = vld [vmem:[%s1131_s1 + $0x8] sm:$0xff] (!%p170_p3)   ;;  %s753_s20 = sshll.u32 (!%p170_p3), %s917_s12, 5  ;;  %v886_v2 = vld [vmem:[%s1131_s1 + $0x10] ss:$0 sps:$4 sm:$0x33] (!%p170_p3)  }
   0x7   : > { %173 = sbr.rel (%p170_p3) target bundleno = 264 (0x108), region = 32  ;;  %814 = vmatprep.subr.bf16.mxu0 (!%p170_p3), %v884_v0  ;;  %852 = vmatprep.subr.bf16.mxu1 (!%p170_p3), %v884_v0  ;;  %p204_p4 = scmp.lt.s32.totalorder (!%p170_p3), %s753_s20, 63  ;;  %vm414_vm0 = vcmask (!%p170_p3), 1041408   ;;  %vm365_vm1 = vcmask (!%p170_p3), 293888   ;;  %v1017_v20 = vld [vmem:[%s1132_s2] ss:$0 sm:$0xff] (!%p170_p3) }
   0x8   : > { %815 = vmatpush3.bf16.msra.mxu0 (!%p170_p3), %v884_v0  ;;  %855 = vmatpush3.bf16.msra.mxu1 (!%p170_p3), %v884_v0  ;;  %v416_v3 = vsel (!%p170_p3), %vm414_vm0, %v886_v2, 0  ;;  %vm611_vm2 = vcmask (!%p170_p3), 64512  }
   0x9   : > { %816 = vmatprep.subr.bf16.mxu0 (!%p170_p3), %v885_v1  ;;  %853 = vmatprep.subr.bf16.mxu1 (!%p170_p3), %v885_v1 }
   0xc   : > { %817 = vmatpush3.bf16.msra.mxu0 (!%p170_p3), %v885_v1  ;;  %856 = vmatpush3.bf16.msra.mxu1 (!%p170_p3), %v885_v1 }
   0xd   : > { %858 = vmatprep.subr.msk.bf16.mxu0 (!%p170_p3), %vm414_vm0, %v886_v2  ;;  %859 = vmatprep.subr.msk.bf16.mxu1 (!%p170_p3), %vm414_vm0, %v886_v2 }
   0xe   : > { %s1139_s20 = smov (!%p204_p4, %s753_s20), 63 }
   0xf   : > { %s754_s23 = sshll.u32 %s1139_s20, 2  ;;  %s756_s29 = sshll.u32 %s1139_s20, 3 }
  0x10   : > { %s980_s26 = scalar_lea.vmem %s1130_s0, %s754_s23  ;;  %819 = vmatpush3.bf16.msra.mxu0 %v416_v3  ;;  %857 = vmatpush3.bf16.msra.mxu1 %v416_v3  ;;  %s1025_s5 = scalar_lea.vmem %s1133_s3, %s756_s29 }
  0x11   : > { %v887_v4 = vld [vmem:[%s980_s26] sm:$0xff]   ;;  %v889_v6 = vld [vmem:[%s980_s26 + $0x8] sm:$0xff]   ;;  %v891_v8 = vld [vmem:[%s980_s26 + $0x10] sm:$0xff]  }
  0x12   : > { %v888_v5 = vld [vmem:[%s980_s26 + $0x40] sm:$0xff]   ;;  %820 = vmatprep.mubr.msk.bf16.mxu0 %vm365_vm1, %v887_v4  ;;  %v890_v7 = vld [vmem:[%s980_s26 + $0x48] sm:$0xff]   ;;  %v892_v9 = vld [vmem:[%s980_s26 + $0x50] sm:$0xff]  }
  0x13   : > { %836 = vmatprep.mubr.msk.bf16.mxu1 %vm365_vm1, %v888_v5  ;;  %821 = vmatmul.mubr.msk.bf16.vlgmr.msra.gmra.mrb[0].mxu0 %vm365_vm1, %v889_v6  ;;  %v893_v10 = vld [vmem:[%s980_s26 + $0x18] sm:$0xff]   ;;  %v895_v12 = vld [vmem:[%s980_s26 + $0x20] sm:$0xff]   ;;  %v897_v14 = vld [vmem:[%s980_s26 + $0x28] sm:$0xff]  }
  0x14   : > { %837 = vmatmul.mubr.msk.bf16.vlgmr.msra.gmra.mrb[0].mxu1 %vm365_vm1, %v890_v7  ;;  %824 = vmatprep.mubr.msk.bf16.mxu0 %vm365_vm1, %v891_v8  ;;  %v894_v11 = vld [vmem:[%s980_s26 + $0x58] sm:$0xff]   ;;  %v896_v13 = vld [vmem:[%s980_s26 + $0x60] sm:$0xff]   ;;  %v898_v15 = vld [vmem:[%s980_s26 + $0x68] sm:$0xff]  }
  0x15   : > { %840 = vmatprep.mubr.msk.bf16.mxu1 %vm365_vm1, %v892_v9  ;;  %v899_v16 = vld [vmem:[%s980_s26 + $0x30] sm:$0xff]   ;;  %v901_v18 = vld [vmem:[%s980_s26 + $0x38] sm:$0xff]  }
  0x16   : > { %v900_v17 = vld [vmem:[%s980_s26 + $0x70] sm:$0xff]   ;;  %v902_v19 = vld [vmem:[%s980_s26 + $0x78] sm:$0xff]  }
  0x1b   : > { %825 = vmatmul.mubr.msk.bf16.gmra.mrb[4].mxu0 %vm365_vm1, %v893_v10 }
  0x1c   : > { %841 = vmatmul.mubr.msk.bf16.gmra.mrb[4].mxu1 %vm365_vm1, %v894_v11  ;;  %828 = vmatprep.mubr.msk.bf16.mxu0 %vm365_vm1, %v895_v12 }
  0x1d   : > { %844 = vmatprep.mubr.msk.bf16.mxu1 %vm365_vm1, %v896_v13 }
  0x23   : > { %829 = vmatmul.mubr.msk.bf16.gmra.mrb[8].mxu0 %vm365_vm1, %v897_v14 }
  0x24   : > { %845 = vmatmul.mubr.msk.bf16.gmra.mrb[8].mxu1 %vm365_vm1, %v898_v15  ;;  %832 = vmatprep.mubr.msk.bf16.mxu0 %vm365_vm1, %v899_v16 }
  0x25   : > { %848 = vmatprep.mubr.msk.bf16.mxu1 %vm365_vm1, %v900_v17 }
  0x2b   : > { %833 = vmatmul.mubr.msk.bf16.gmra.mrb[12].mxu0 %vm365_vm1, %v901_v18 }
  0x2c   : > { %849 = vmatmul.mubr.msk.bf16.gmra.mrb[12].mxu1 %vm365_vm1, %v902_v19 }
  0xe6   : > { %v822_v21 = vpop.f32.mrb[0].mxu0 }
  0xe7   : > { %v838_v22 = vpop.f32.mrb[0].mxu1  ;;  %v461_v23 = vadd.f32 %v822_v21, %v1017_v20  ;;  %v452_v25 = vpop.f32.mrb[1].mxu0 }
  0xe8   : > { %v525_v24 = vadd.f32 %v838_v22, %v1017_v20  ;;  %v516_v26 = vpop.f32.mrb[1].mxu1  ;;  %v453_v27 = vadd.f32 %v1017_v20, %v452_v25  ;;  %v823_v29 = vpop.f32.mrb[2].mxu0 }
  0xe9   : > { %v517_v28 = vadd.f32 %v1017_v20, %v516_v26  ;;  %v839_v30 = vpop.f32.mrb[2].mxu1  ;;  %v581_v31 = vmax.f32 %v461_v23, 0.0  ;;  %v464_v33 = vadd.f32 %v823_v29, %v1017_v20  ;;  %v455_v35 = vpop.f32.mrb[3].mxu0 }
  0xea   : > { %v597_v32 = vmax.f32 %v525_v24, 0.0  ;;  %v528_v34 = vadd.f32 %v839_v30, %v1017_v20  ;;  %v519_v36 = vpop.f32.mrb[3].mxu1  ;;  %v579_v37 = vmax.f32 %v453_v27, 0.0  ;;  %v456_v39 = vadd.f32 %v1017_v20, %v455_v35 }
  0xeb   : > { %v595_v38 = vmax.f32 %v517_v28, 0.0  ;;  %v520_v40 = vadd.f32 %v1017_v20, %v519_v36  ;;  %614 = vst.msk [vmem:[%s1025_s5 + $0x10] sm:$0xff] %vm611_vm2, %v581_v31  ;;  %v582_v41 = vmax.f32 %v464_v33, 0.0 }
  0xec   : > { %630 = vst.msk [vmem:[%s1025_s5 + $0x90] sm:$0xff] %vm611_vm2, %v597_v32  ;;  %v598_v42 = vmax.f32 %v528_v34, 0.0  ;;  %612 = vst.msk [vmem:[%s1025_s5] sm:$0xff] %vm611_vm2, %v579_v37  ;;  %v580_v43 = vmax.f32 %v456_v39, 0.0 }
  0xed   : > { %628 = vst.msk [vmem:[%s1025_s5 + $0x80] sm:$0xff] %vm611_vm2, %v595_v38  ;;  %v596_v44 = vmax.f32 %v520_v40, 0.0  ;;  %615 = vst.msk [vmem:[%s1025_s5 + $0x18] sm:$0xff] %vm611_vm2, %v582_v41 }
  0xee   : > { %631 = vst.msk [vmem:[%s1025_s5 + $0x98] sm:$0xff] %vm611_vm2, %v598_v42  ;;  %613 = vst.msk [vmem:[%s1025_s5 + $0x8] sm:$0xff] %vm611_vm2, %v580_v43  ;;  %v826_v45 = vpop.f32.mrb[4].mxu0 }
  0xef   : > { %629 = vst.msk [vmem:[%s1025_s5 + $0x88] sm:$0xff] %vm611_vm2, %v596_v44  ;;  %v842_v46 = vpop.f32.mrb[4].mxu1  ;;  %v477_v47 = vadd.f32 %v826_v45, %v1017_v20  ;;  %v468_v49 = vpop.f32.mrb[5].mxu0 }
  0xf0   : > { %v541_v48 = vadd.f32 %v842_v46, %v1017_v20  ;;  %v532_v50 = vpop.f32.mrb[5].mxu1  ;;  %v469_v51 = vadd.f32 %v1017_v20, %v468_v49  ;;  %v827_v53 = vpop.f32.mrb[6].mxu0 }
  0xf1   : > { %v533_v52 = vadd.f32 %v1017_v20, %v532_v50  ;;  %v843_v54 = vpop.f32.mrb[6].mxu1  ;;  %v585_v55 = vmax.f32 %v477_v47, 0.0  ;;  %v480_v57 = vadd.f32 %v827_v53, %v1017_v20  ;;  %v471_v59 = vpop.f32.mrb[7].mxu0 }
  0xf2   : > { %v601_v56 = vmax.f32 %v541_v48, 0.0  ;;  %v544_v58 = vadd.f32 %v843_v54, %v1017_v20  ;;  %v535_v60 = vpop.f32.mrb[7].mxu1  ;;  %v583_v61 = vmax.f32 %v469_v51, 0.0  ;;  %v472_v63 = vadd.f32 %v1017_v20, %v471_v59 }
  0xf3   : > { %v599_v62 = vmax.f32 %v533_v52, 0.0  ;;  %v536_v0 = vadd.f32 %v1017_v20, %v535_v60  ;;  %618 = vst.msk [vmem:[%s1025_s5 + $0x30] sm:$0xff] %vm611_vm2, %v585_v55  ;;  %v586_v1 = vmax.f32 %v480_v57, 0.0 }
  0xf4   : > { %634 = vst.msk [vmem:[%s1025_s5 + $0xb0] sm:$0xff] %vm611_vm2, %v601_v56  ;;  %v602_v2 = vmax.f32 %v544_v58, 0.0  ;;  %616 = vst.msk [vmem:[%s1025_s5 + $0x20] sm:$0xff] %vm611_vm2, %v583_v61  ;;  %v584_v3 = vmax.f32 %v472_v63, 0.0 }
  0xf5   : > { %632 = vst.msk [vmem:[%s1025_s5 + $0xa0] sm:$0xff] %vm611_vm2, %v599_v62  ;;  %v600_v4 = vmax.f32 %v536_v0, 0.0  ;;  %619 = vst.msk [vmem:[%s1025_s5 + $0x38] sm:$0xff] %vm611_vm2, %v586_v1 }
  0xf6   : > { %635 = vst.msk [vmem:[%s1025_s5 + $0xb8] sm:$0xff] %vm611_vm2, %v602_v2  ;;  %617 = vst.msk [vmem:[%s1025_s5 + $0x28] sm:$0xff] %vm611_vm2, %v584_v3  ;;  %v830_v5 = vpop.f32.mrb[8].mxu0 }
  0xf7   : > { %633 = vst.msk [vmem:[%s1025_s5 + $0xa8] sm:$0xff] %vm611_vm2, %v600_v4  ;;  %v846_v6 = vpop.f32.mrb[8].mxu1  ;;  %v493_v7 = vadd.f32 %v830_v5, %v1017_v20  ;;  %v484_v9 = vpop.f32.mrb[9].mxu0 }
  0xf8   : > { %v557_v8 = vadd.f32 %v846_v6, %v1017_v20  ;;  %v548_v10 = vpop.f32.mrb[9].mxu1  ;;  %v485_v11 = vadd.f32 %v1017_v20, %v484_v9  ;;  %v831_v13 = vpop.f32.mrb[10].mxu0 }
  0xf9   : > { %v549_v12 = vadd.f32 %v1017_v20, %v548_v10  ;;  %v847_v14 = vpop.f32.mrb[10].mxu1  ;;  %v589_v15 = vmax.f32 %v493_v7, 0.0  ;;  %v496_v17 = vadd.f32 %v831_v13, %v1017_v20  ;;  %v487_v19 = vpop.f32.mrb[11].mxu0 }
  0xfa   : > { %v605_v16 = vmax.f32 %v557_v8, 0.0  ;;  %v560_v18 = vadd.f32 %v847_v14, %v1017_v20  ;;  %v551_v21 = vpop.f32.mrb[11].mxu1  ;;  %v587_v22 = vmax.f32 %v485_v11, 0.0  ;;  %v488_v24 = vadd.f32 %v1017_v20, %v487_v19 }
  0xfb   : > { %v603_v23 = vmax.f32 %v549_v12, 0.0  ;;  %v552_v25 = vadd.f32 %v1017_v20, %v551_v21  ;;  %622 = vst.msk [vmem:[%s1025_s5 + $0x50] sm:$0xff] %vm611_vm2, %v589_v15  ;;  %v590_v26 = vmax.f32 %v496_v17, 0.0 }
  0xfc   : > { %638 = vst.msk [vmem:[%s1025_s5 + $0xd0] sm:$0xff] %vm611_vm2, %v605_v16  ;;  %v606_v27 = vmax.f32 %v560_v18, 0.0  ;;  %620 = vst.msk [vmem:[%s1025_s5 + $0x40] sm:$0xff] %vm611_vm2, %v587_v22  ;;  %v588_v28 = vmax.f32 %v488_v24, 0.0 }
  0xfd   : > { %636 = vst.msk [vmem:[%s1025_s5 + $0xc0] sm:$0xff] %vm611_vm2, %v603_v23  ;;  %v604_v29 = vmax.f32 %v552_v25, 0.0  ;;  %623 = vst.msk [vmem:[%s1025_s5 + $0x58] sm:$0xff] %vm611_vm2, %v590_v26 }
  0xfe   : > { %639 = vst.msk [vmem:[%s1025_s5 + $0xd8] sm:$0xff] %vm611_vm2, %v606_v27  ;;  %621 = vst.msk [vmem:[%s1025_s5 + $0x48] sm:$0xff] %vm611_vm2, %v588_v28  ;;  %v834_v30 = vpop.f32.mrb[12].mxu0 }
  0xff   : > { %637 = vst.msk [vmem:[%s1025_s5 + $0xc8] sm:$0xff] %vm611_vm2, %v604_v29  ;;  %v850_v31 = vpop.f32.mrb[12].mxu1  ;;  %v509_v32 = vadd.f32 %v834_v30, %v1017_v20  ;;  %v500_v34 = vpop.f32.mrb[13].mxu0 }
 0x100   : > { %v573_v33 = vadd.f32 %v850_v31, %v1017_v20  ;;  %v564_v35 = vpop.f32.mrb[13].mxu1  ;;  %v501_v36 = vadd.f32 %v1017_v20, %v500_v34  ;;  %v835_v38 = vpop.f32.mrb[14].mxu0 }
 0x101   : > { %v565_v37 = vadd.f32 %v1017_v20, %v564_v35  ;;  %v851_v39 = vpop.f32.mrb[14].mxu1  ;;  %v593_v40 = vmax.f32 %v509_v32, 0.0  ;;  %v512_v42 = vadd.f32 %v835_v38, %v1017_v20  ;;  %v503_v44 = vpop.f32.mrb[15].mxu0 }
 0x102   : > { %v609_v41 = vmax.f32 %v573_v33, 0.0  ;;  %v576_v43 = vadd.f32 %v851_v39, %v1017_v20  ;;  %v567_v45 = vpop.f32.mrb[15].mxu1  ;;  %v591_v46 = vmax.f32 %v501_v36, 0.0  ;;  %v504_v48 = vadd.f32 %v1017_v20, %v503_v44 }
 0x103   : > { %v607_v47 = vmax.f32 %v565_v37, 0.0  ;;  %v568_v49 = vadd.f32 %v1017_v20, %v567_v45  ;;  %626 = vst.msk [vmem:[%s1025_s5 + $0x70] sm:$0xff] %vm611_vm2, %v593_v40  ;;  %v594_v50 = vmax.f32 %v512_v42, 0.0 }
 0x104   : > { %642 = vst.msk [vmem:[%s1025_s5 + $0xf0] sm:$0xff] %vm611_vm2, %v609_v41  ;;  %v610_v51 = vmax.f32 %v576_v43, 0.0  ;;  %624 = vst.msk [vmem:[%s1025_s5 + $0x60] sm:$0xff] %vm611_vm2, %v591_v46  ;;  %v592_v52 = vmax.f32 %v504_v48, 0.0 }
 0x105   : > { %640 = vst.msk [vmem:[%s1025_s5 + $0xe0] sm:$0xff] %vm611_vm2, %v607_v47  ;;  %v608_v53 = vmax.f32 %v568_v49, 0.0  ;;  %627 = vst.msk [vmem:[%s1025_s5 + $0x78] sm:$0xff] %vm611_vm2, %v594_v50 }
 0x106   : > { %643 = vst.msk [vmem:[%s1025_s5 + $0xf8] sm:$0xff] %vm611_vm2, %v610_v51  ;;  %625 = vst.msk [vmem:[%s1025_s5 + $0x68] sm:$0xff] %vm611_vm2, %v592_v52 }
 0x107   : > { %641 = vst.msk [vmem:[%s1025_s5 + $0xe8] sm:$0xff] %vm611_vm2, %v608_v53 }
 0x108 PF: > { %s13_s14 = sadd.s32 1, %s925_s14   ;;  %s1134_s12 = smov %s921_s13 }
 0x109   : > { %p10_p5 = scmp.ge.s32.totalorder %s13_s14, 4   ;;  %s1135_s13 = smov %s1137_s15 }
 0x10b   :  { %12 = sbr.rel (!%p10_p5) target bundleno = 2 (0x2), region = 68 }

</bundles_post_ra>
